<compile_context>
chip_gen: v5e
topology: v5e:2x2
jax: 0.10.0
libtpu: 0.0.40
codegen_flags: <defaults>
</compile_context>

<pallas_src>
import jax
import jax.numpy as jnp
import numpy as np
from jax import lax
from jax.experimental import pallas as pl
from jax.experimental.pallas import tpu as pltpu


def _attention_pooling_kernel(x_ref, q_ref, o_ref, acc_ref):
    # x_ref:   (1, C, Tl)  slab of the channel-first input
    # q_ref:   (K, C)      query parameter (constant index map -> fetched once)
    # o_ref:   (1, C, K)   pooled output for this batch element
    # acc_ref: (C, K) f32  accumulator, resident across the L-tile grid axis
    li = pl.program_id(1)

    @pl.when(li == 0)
    def _init():
        acc_ref[...] = jnp.zeros_like(acc_ref)

    xb = x_ref[0].astype(jnp.float32)           # (C, Tl)
    q = q_ref[...].astype(jnp.float32)          # (K, C)

    # scores^T: st[k, l] = sum_c q[k, c] * x[c, l]            -> (K, Tl)  (MXU)
    st = jnp.dot(q, xb, preferred_element_type=jnp.float32)

    # softmax over K (sublane axis) == torch.softmax(scores, dim=-1)
    m = jnp.max(st, axis=0, keepdims=True)       # (1, Tl)
    e = jnp.exp(st - m)                          # (K, Tl)
    w = e / jnp.sum(e, axis=0, keepdims=True)    # (K, Tl)

    # out[c, k] += sum_l x[c, l] * w[k, l]  (contract the lane/L axis of both; MXU)
    acc_ref[...] += lax.dot_general(
        xb, w,
        dimension_numbers=(((1,), (1,)), ((), ())),
        preferred_element_type=jnp.float32,
    )

    @pl.when(li == pl.num_programs(1) - 1)
    def _store():
        o_ref[0] = acc_ref[...].astype(o_ref.dtype)


def _pick_time_tile(L, max_tile):
    """Pick an L tile that satisfies the (8,128) lane constraint."""
    cands = [t for t in (1024, 512, 256, 128) if t <= max_tile]
    for t in cands:
        if L % t == 0:
            return t, L
    if L <= max_tile:
        return L, L                    # single full-extent block (exempt from /128 rule)
    Lp = ((L + 127) // 128) * 128      # zero-pad L; padded positions contribute 0
    for t in cands:
        if Lp % t == 0:
            return t, Lp
    return 128, Lp


def attention_pooling(x, query, *, max_time_tile=512):
    """x: (B, C, L) channel-first. query: (K, C). Returns (B, C, K) (PyTorch layout)."""
    B, C, L = x.shape
    K, Cq = query.shape
    assert Cq == C, (Cq, C)

    Tl, Lp = _pick_time_tile(L, max_time_tile)
    xp = x if Lp == L else jnp.pad(x, ((0, 0), (0, 0), (0, Lp - L)))
    n_l = Lp // Tl

    # Explicit VMEM budget: 2x double-buffered input slab + 2x output block
    # + 2x query + f32 accumulator, with headroom. Well under 64 MiB (v7x).
    isz = x.dtype.itemsize
    vmem_bytes = 2 * C * Tl * isz + 2 * C * K * isz + 2 * K * C * isz + C * K * 4
    vmem_limit = int(min(max(vmem_bytes + (4 << 20), 8 << 20), 48 << 20))

    return pl.pallas_call(
        _attention_pooling_kernel,
        out_shape=jax.ShapeDtypeStruct((B, C, K), x.dtype),
        grid_spec=pltpu.PrefetchScalarGridSpec(
            num_scalar_prefetch=0,
            grid=(B, n_l),                                   # reduction (L) axis last
            in_specs=[
                pl.BlockSpec((1, C, Tl), lambda b, l: (b, 0, l)),
                pl.BlockSpec((K, C), lambda b, l: (0, 0)),
            ],
            out_specs=pl.BlockSpec((1, C, K), lambda b, l: (b, 0, 0)),
            scratch_shapes=[pltpu.VMEM((C, K), jnp.float32)],
        ),
        compiler_params=pltpu.CompilerParams(
            dimension_semantics=("parallel", "arbitrary"),
            vmem_limit_bytes=vmem_limit,
        ),
    )(xp, query)


def _reference(x, query):
    """Pure-JAX mirror of the PyTorch AttentionPooling.forward."""
    xt = jnp.transpose(x, (0, 2, 1))                               # (B, L, C)
    scores = jnp.einsum("blc,kc->blk", xt, query,
                        precision=lax.Precision.HIGHEST)           # (B, L, K)
    weights = jax.nn.softmax(scores, axis=-1)                      # softmax over K
    out = jnp.einsum("blk,blc->bkc", weights, xt,
                     precision=lax.Precision.HIGHEST)              # (B, K, C)
    return jnp.transpose(out, (0, 2, 1))                           # (B, C, K)


if __name__ == "__main__":
    key = jax.random.PRNGKey(0)
    kx, kq = jax.random.split(key)

    B, C, L, K = 2, 384, 256, 8
    x = jax.random.normal(kx, (B, C, L), dtype=jnp.float32)
    query = jax.random.normal(kq, (K, C), dtype=jnp.float32)   # nn.Parameter(torch.randn(K, C))

    # max_time_tile=128 -> 2 L-tiles per batch element, exercising the
    # accumulate-across-tiles path as well as the parallel batch axis.
    out = jax.block_until_ready(attention_pooling(x, query, max_time_tile=128))
    ref = jax.block_until_ready(_reference(x, query))

    assert out.shape == ref.shape == (B, C, K)
    np.testing.assert_allclose(np.asarray(out), np.asarray(ref), rtol=1e-3, atol=1e-3)
    print("KERNEL_OK")
</pallas_src>

<mosaic_0001>
module attributes {stable_mosaic.version = 11 : i64} {
  func.func @_attention_pooling_kernel(%arg0: i32, %arg1: i32, %arg2: memref<1x384x128xf32, #tpu.memory_space<vmem>>, %arg3: memref<8x384xf32, #tpu.memory_space<vmem>>, %arg4: memref<1x384x8xf32, #tpu.memory_space<vmem>>, %arg5: memref<384x8xf32, #tpu.memory_space<vmem>>) attributes {dimension_semantics = [#tpu.dimension_semantics<parallel>, #tpu.dimension_semantics<arbitrary>], iteration_bounds = array<i64: 2, 2>, scalar_prefetch = 0 : i64, scratch_operands = 1 : i64, tpu.core_type = #tpu.core_type<tc>, window_params = [{transform_indices = @transform_0, window_bounds = array<i64: 1, 384, 128>}, {pipeline_mode = #tpu.pipeline_mode<synchronous>, transform_indices = @transform_1, window_bounds = array<i64: 8, 384>}, {transform_indices = @transform_2, window_bounds = array<i64: 1, 384, 8>}]} {
    %c0_i32 = arith.constant 0 : i32
    %0 = arith.cmpi eq, %arg1, %c0_i32 : i32
    %1 = arith.extui %0 : i1 to i32
    %c0_i32_0 = arith.constant 0 : i32
    %2 = arith.cmpi ne, %1, %c0_i32_0 : i32
    scf.if %2 {
      %cst_13 = arith.constant 0.000000e+00 : f32
      %23 = vector.broadcast %cst_13 : f32 to vector<384x8xf32>
      %c0_14 = arith.constant 0 : index
      %c0_15 = arith.constant 0 : index
      %24 = vector.load %arg5[%c0_14, %c0_15] : memref<384x8xf32, #tpu.memory_space<vmem>>, vector<384x8xf32>
      tpu.vector_store %arg5[%c0_14, %c0_15], %23 {strides = array<i32>} : memref<384x8xf32, #tpu.memory_space<vmem>>, vector<384x8xf32>,
    } else {
    }
    %c0 = arith.constant 0 : index
    %c0_1 = arith.constant 0 : index
    %c0_2 = arith.constant 0 : index
    %3 = vector.load %arg2[%c0, %c0_1, %c0_2] : memref<1x384x128xf32, #tpu.memory_space<vmem>>, vector<1x384x128xf32>
    %4 = vector.shape_cast %3 : vector<1x384x128xf32> to vector<384x128xf32>
    %c0_3 = arith.constant 0 : index
    %c0_4 = arith.constant 0 : index
    %5 = vector.load %arg3[%c0_3, %c0_4] : memref<8x384xf32, #tpu.memory_space<vmem>>, vector<8x384xf32>
    %cst = arith.constant dense<0.000000e+00> : vector<8x128xf32>
    %6 = tpu.matmul %5, %4, %cst {dimension_numbers = #tpu.dot_dimension_numbers<[1], [0], [0], [1], [0, 0, 1, 1], [], []>} : vector<8x384xf32>, vector<384x128xf32>, vector<8x128xf32> -> vector<8x128xf32>
    %cst_5 = arith.constant dense<0xFF800000> : vector<128xf32>
    %7 = vector.multi_reduction <maximumf>, %6, %cst_5 [0] : vector<8x128xf32> to vector<128xf32>
    %8 = vector.shape_cast %7 : vector<128xf32> to vector<1x128xf32>
    %9 = vector.broadcast %8 : vector<1x128xf32> to vector<8x128xf32>
    %10 = arith.subf %6, %9 : vector<8x128xf32>
    %11 = math.exp %10 : vector<8x128xf32>
    %cst_6 = arith.constant dense<0.000000e+00> : vector<128xf32>
    %12 = vector.multi_reduction <add>, %11, %cst_6 [0] : vector<8x128xf32> to vector<128xf32>
    %13 = vector.shape_cast %12 : vector<128xf32> to vector<1x128xf32>
    %14 = vector.broadcast %13 : vector<1x128xf32> to vector<8x128xf32>
    %15 = arith.divf %11, %14 : vector<8x128xf32>
    %c0_7 = arith.constant 0 : index
    %c0_8 = arith.constant 0 : index
    %16 = vector.load %arg5[%c0_7, %c0_8] : memref<384x8xf32, #tpu.memory_space<vmem>>, vector<384x8xf32>
    %cst_9 = arith.constant dense<0.000000e+00> : vector<384x8xf32>
    %17 = tpu.matmul %4, %15, %cst_9 {dimension_numbers = #tpu.dot_dimension_numbers<[1], [1], [0], [0], [0, 0, 1, 0], [], []>} : vector<384x128xf32>, vector<8x128xf32>, vector<384x8xf32> -> vector<384x8xf32>
    %18 = arith.addf %16, %17 : vector<384x8xf32>
    %c0_10 = arith.constant 0 : index
    %c0_11 = arith.constant 0 : index
    %19 = vector.load %arg5[%c0_10, %c0_11] : memref<384x8xf32, #tpu.memory_space<vmem>>, vector<384x8xf32>
    tpu.vector_store %arg5[%c0_10, %c0_11], %18 {strides = array<i32>} : memref<384x8xf32, #tpu.memory_space<vmem>>, vector<384x8xf32>,
    %c1_i32 = arith.constant 1 : i32
    %20 = arith.cmpi eq, %arg1, %c1_i32 : i32
    %21 = arith.extui %20 : i1 to i32
    %c0_i32_12 = arith.constant 0 : i32
    %22 = arith.cmpi ne, %21, %c0_i32_12 : i32
    scf.if %22 {
      %c0_13 = arith.constant 0 : index
      %c0_14 = arith.constant 0 : index
      %23 = vector.load %arg5[%c0_13, %c0_14] : memref<384x8xf32, #tpu.memory_space<vmem>>, vector<384x8xf32>
      %c0_15 = arith.constant 0 : index
      %c0_16 = arith.constant 0 : index
      %c0_17 = arith.constant 0 : index
      %24 = vector.load %arg4[%c0_15, %c0_16, %c0_17] : memref<1x384x8xf32, #tpu.memory_space<vmem>>, vector<1x384x8xf32>
      %25 = vector.shape_cast %24 : vector<1x384x8xf32> to vector<384x8xf32>
      %26 = vector.shape_cast %23 : vector<384x8xf32> to vector<1x384x8xf32>
      tpu.vector_store %arg4[%c0_15, %c0_16, %c0_17], %26 {strides = array<i32>} : memref<1x384x8xf32, #tpu.memory_space<vmem>>, vector<1x384x8xf32>,
    } else {
    }
    return
  }
  func.func @transform_0(%arg0: i32, %arg1: i32) -> (i32, i32, i32) {
    %c0_i32 = arith.constant 0 : i32
    %c0_i32_0 = arith.constant 0 : i32
    return %arg0, %c0_i32, %arg1 : i32, i32, i32
  }
  func.func @transform_1(%arg0: i32, %arg1: i32) -> (i32, i32) {
    %c0_i32 = arith.constant 0 : i32
    %c0_i32_0 = arith.constant 0 : i32
    %c0_i32_1 = arith.constant 0 : i32
    return %c0_i32, %c0_i32_0 : i32, i32
  }
  func.func @transform_2(%arg0: i32, %arg1: i32) -> (i32, i32, i32) {
    %c0_i32 = arith.constant 0 : i32
    %c0_i32_0 = arith.constant 0 : i32
    %c0_i32_1 = arith.constant 0 : i32
    return %arg0, %c0_i32, %c0_i32_0 : i32, i32, i32
  }
}

</mosaic_0001>

<bundles_post_ra>
// kernel: tpu_custom_call.1
= control target key start
LH: loop header
LB: loop body
LE: loop exit
PB: predicated region body
PF: predicated region fallthrough
CT: control target
= control target key end

     0   :  { %s1720_s0 = inlined_call_operand.hbm [shape: f32[2,384,256], index: 0, kind: input, shape index: {}]   ;;  %s1721_s1 = inlined_call_operand.hbm [shape: f32[8,384], index: 1, kind: input, shape index: {}]   ;;  %s1722_s2 = inlined_call_operand.vmem [shape: f32[2,384,8], index: 2, kind: output, shape index: {}]  }
   0x1   :  { %1729 = sst [smem:[#allocation15_spill]] %s1721_s1 }
   0x2   :  { %7 = vsyncpa [#allocation4], 0 }
   0x3   :  { %9 = vsyncpa [#allocation4 + $0x1], 0 }
   0x4   :  { %10 = vsyncpa [#allocation6], 0  ;;  %s1148_s9 = smov 0   ;;  %s1150_s10 = smov 0  }
   0x5   :  { %s1152_s11 = smov 0   ;;  %s1154_s12 = smov 0  }
   0x6   :  { %s1156_s13 = smov 0   ;;  %s1158_s14 = smov 0  }
   0x7   :  { %s1160_s15 = smov 0   ;;  %s1162_s16 = smov 0  }
   0x8 LB: > { %1730 = sst [smem:[#allocation9_spill]] %s1126_s16  ;;  %s886_s17 = sadd.s32 4294967295, %s1126_s16   ;;  %s1126_s16 = sphi %s1162_s16, %s16_s16   ;;  %s1122_s15 = sphi %s1160_s15, %s1754_s15   ;;  %s1118_s14 = sphi %s1158_s14, %s1753_s14   ;;  %s1114_s13 = sphi %s1156_s13, %s1752_s13   ;;  %s1110_s12 = sphi %s1154_s12, %s1751_s12   ;;  %s1106_s11 = sphi %s1152_s11, %s1750_s11   ;;  %s1102_s10 = sphi %s1150_s10, %s1749_s10   ;;  %s1098_s9 = sphi %s1148_s9, %s1748_s9  }
   0x9   : > { %s37_s18 = sadd.s32 1, %s1106_s11  ;;  %p44_p0 = scmp.ne.s32.totalorder %s1106_s11, %s1102_s10 }
   0xa   : > { %p45_p1 = scmp.eq.s32.totalorder %s1126_s16, 0  ;;  %p50_p2 = scmp.ne.s32.totalorder %s1102_s10, %s1098_s9 }
   0xb   : > { %p1192_p3 = scmp.eq.s32.totalorder %s886_s17, 0  ;;  %p888_p5 = scmp.ge.s32.totalorder %s1126_s16, 1 }
   0xc   : > { %p1196_p4 = por %p45_p1, %p44_p0  ;;  %p108_p7 = scmp.lt.s32.totalorder %s1126_s16, 5 }
   0xd   : > { %p1203_p6 = por %p1192_p3, %p50_p2  ;;  %s1734_s1 = sld [smem:[#allocation15_spill]] }
   0xe   : > { %p1211_p8 = pnand %p888_p5, %p108_p7  ;;  %s1128_s26 = smov [#allocation5]  }
   0xf   : > { %s122_s27 = sshll.u32 %s1128_s26, 4  ;;  %p921_p10 = scmp.lt.s32.totalorder %s1126_s16, 4  ;;  %s123_s27 = int_to_ptr.vmem [resolvable:$true] %s122_s27 }
  0x10   : > { %p912_p9 = pneg %p1211_p8  ;;  %s25_s29 = sadd.s32 1, %s1118_s14 }
  0x11   : > { %p1222_p12 = pnand %p921_p10, %p1196_p4  ;;  %s28_s30 = sadd.s32 1, %s1122_s15 }
  0x12   : > { %p913_p11 = pnand %p912_p9, %p1192_p3  ;;  %p26_p13 = scmp.ge.s32.totalorder %s25_s29, 2 }
  0x13   : > { %s120_s24 = sshll.u32 %s1734_s1, 4  ;;  %s133_s3 = sand.u32 1, %s1106_s11   ;;  %s121_s24 = int_to_ptr.hbm [resolvable:$true] %s120_s24 }
  0x14   : > { %915 = dma.hbm_to_vmem [thread:$0]  (!%p913_p11), %s121_s24, 384, %s123_s27, [#allocation6]  }
  0x15   : > { %s902_s4 = smul.u32 384, %s133_s3  ;;  %s1756_s29 = smov (%p26_p13, %s25_s29), 0 }
  0x16   : > { %1737 = sst [smem:[#allocation10_spill]] %s1756_s29  ;;  %s1758_s30 = smov (!%p26_p13, %s28_s30), %s1122_s15 }
  0x17   : > { %s33_s5 = ssub.s32 %s1118_s14, %s1756_s29  ;;  %p30_p0 = scmp.ge.s32.totalorder %s1758_s30, 2 }
  0x18   : > { %s903_s6 = smul.u32 96, %s1122_s15  ;;  %s137_s7 = scalar_lea.vmem [#allocation3], %s902_s4 }
  0x19   : > { %s146_s8 = sshll.u32 %s137_s7, 4  ;;  %s1760_s30 = smov (%p30_p0, %s1758_s30), 0  ;;  %s147_s8 = int_to_ptr.vmem [resolvable:$true] %s146_s8 }
  0x1a   : > { %s141_s9 = sadd.s32 %s1118_s14, %s903_s6  ;;  %s32_s17 = ssub.s32 %s1122_s15, %s1760_s30 }
  0x1b   : > { %s891_s20 = sshll.u32 %s141_s9, 3  ;;  %s34_s22 = sor.u32 %s33_s5, %s32_s17 }
  0x1c   : > { %s143_s26 = scalar_lea.hbm %s1720_s0, %s891_s20  ;;  %p35_p1 = scmp.eq.s32.totalorder %s34_s22, 0 }
  0x1d   : > { %s144_s27 = sshll.u32 %s143_s26, 4  ;;  %s134_s4 = scalar_lea.sflag [#allocation4], %s133_s3  ;;  %s145_s27 = int_to_ptr.hbm [resolvable:$true] %s144_s27 }
  0x1e   : > { %s1246_s1 = scalar_select %p35_p1, %s1106_s11, %s37_s18  }
  0x1f   : > { %s1129_s7 = smov 256   ;;  %s1130_s29 = smov 128  }
  0x20   : > { %s1131_s16 = smov 8   ;;  %158 = sbr.rel (%p1211_p8) target bundleno = 628 (0x274), region = 28 }
  0x21   : > { %919 = dma.hbm_to_vmem [thread:$0]  (!%p1222_p12), %s145_s27, 6144, %s147_s8, %s134_s4, %s1129_s7, %s1130_s29, %s1131_s16  }
  0x25   : > { %s160_s5 = sand.u32 1, %s1102_s10  }
  0x26   : > { %s904_s6 = smul.u32 384, %s160_s5  ;;  %s161_s9 = scalar_lea.sflag [#allocation4], %s160_s5 }
  0x28   : > { %s1253_s17 = scalar_lea.vmem [#allocation3], %s904_s6 }
  0x29   : > { %1089 = dma.done.wait (%p1203_p6), %s161_s9, 6144  }
  0x2a   : > { %1091 = vsyncadd (%p1203_p6), %s161_s9, 4294961152 }
  0x2b   : > { %1093 = dma.done.wait (%p1192_p3), [#allocation6], 384  }
  0x2c   : > { %1095 = vsyncadd (%p1192_p3), [#allocation6], 4294966912  ;;  %p191_p2 = scmp.lt.s32.totalorder %s1114_s13, 1  ;;  %p895_p4 = scmp.ne.s32.totalorder %s1110_s12, 0 }
  0x2e   : > { %s1762_s13 = smov (!%p191_p2, %s1114_s13), 1  ;;  %199 = sbr.rel (%p895_p4) target bundleno = 100 (0x64), region = 40 }
  0x2f   : > { %s905_s16 = smul.u32 384, %s1762_s13 }
  0x31   : > { %s1268_s28 = scalar_lea.vmem %s1722_s2, %s905_s16 }
  0x33   : > { %vm200_vm0 = vcmask 64512   ;;  %v1132_v0 = vmov 0.0  }
  0x34   : > { %201 = vst.msk [vmem:[#allocation2] sm:$0xff] %vm200_vm0, %v1132_v0 }
  0x35   : > { %202 = vst.msk [vmem:[#allocation2 + $0x8] sm:$0xff] %vm200_vm0, %v1132_v0 }
  0x36   : > { %203 = vst.msk [vmem:[#allocation2 + $0x10] sm:$0xff] %vm200_vm0, %v1132_v0 }
  0x37   : > { %204 = vst.msk [vmem:[#allocation2 + $0x18] sm:$0xff] %vm200_vm0, %v1132_v0 }
  0x38   : > { %205 = vst.msk [vmem:[#allocation2 + $0x20] sm:$0xff] %vm200_vm0, %v1132_v0 }
  0x39   : > { %206 = vst.msk [vmem:[#allocation2 + $0x28] sm:$0xff] %vm200_vm0, %v1132_v0 }
  0x3a   : > { %207 = vst.msk [vmem:[#allocation2 + $0x30] sm:$0xff] %vm200_vm0, %v1132_v0 }
  0x3b   : > { %208 = vst.msk [vmem:[#allocation2 + $0x38] sm:$0xff] %vm200_vm0, %v1132_v0 }
  0x3c   : > { %209 = vst.msk [vmem:[#allocation2 + $0x40] sm:$0xff] %vm200_vm0, %v1132_v0 }
  0x3d   : > { %210 = vst.msk [vmem:[#allocation2 + $0x48] sm:$0xff] %vm200_vm0, %v1132_v0 }
  0x3e   : > { %211 = vst.msk [vmem:[#allocation2 + $0x50] sm:$0xff] %vm200_vm0, %v1132_v0 }
  0x3f   : > { %212 = vst.msk [vmem:[#allocation2 + $0x58] sm:$0xff] %vm200_vm0, %v1132_v0 }
  0x40   : > { %213 = vst.msk [vmem:[#allocation2 + $0x60] sm:$0xff] %vm200_vm0, %v1132_v0 }
  0x41   : > { %214 = vst.msk [vmem:[#allocation2 + $0x68] sm:$0xff] %vm200_vm0, %v1132_v0 }
  0x42   : > { %215 = vst.msk [vmem:[#allocation2 + $0x70] sm:$0xff] %vm200_vm0, %v1132_v0 }
  0x43   : > { %216 = vst.msk [vmem:[#allocation2 + $0x78] sm:$0xff] %vm200_vm0, %v1132_v0 }
  0x44   : > { %217 = vst.msk [vmem:[#allocation2 + $0x80] sm:$0xff] %vm200_vm0, %v1132_v0 }
  0x45   : > { %218 = vst.msk [vmem:[#allocation2 + $0x88] sm:$0xff] %vm200_vm0, %v1132_v0 }
  0x46   : > { %219 = vst.msk [vmem:[#allocation2 + $0x90] sm:$0xff] %vm200_vm0, %v1132_v0 }
  0x47   : > { %220 = vst.msk [vmem:[#allocation2 + $0x98] sm:$0xff] %vm200_vm0, %v1132_v0 }
  0x48   : > { %221 = vst.msk [vmem:[#allocation2 + $0xa0] sm:$0xff] %vm200_vm0, %v1132_v0 }
  0x49   : > { %222 = vst.msk [vmem:[#allocation2 + $0xa8] sm:$0xff] %vm200_vm0, %v1132_v0 }
  0x4a   : > { %223 = vst.msk [vmem:[#allocation2 + $0xb0] sm:$0xff] %vm200_vm0, %v1132_v0 }
  0x4b   : > { %224 = vst.msk [vmem:[#allocation2 + $0xb8] sm:$0xff] %vm200_vm0, %v1132_v0 }
  0x4c   : > { %225 = vst.msk [vmem:[#allocation2 + $0xc0] sm:$0xff] %vm200_vm0, %v1132_v0 }
  0x4d   : > { %226 = vst.msk [vmem:[#allocation2 + $0xc8] sm:$0xff] %vm200_vm0, %v1132_v0 }
  0x4e   : > { %227 = vst.msk [vmem:[#allocation2 + $0xd0] sm:$0xff] %vm200_vm0, %v1132_v0 }
  0x4f   : > { %228 = vst.msk [vmem:[#allocation2 + $0xd8] sm:$0xff] %vm200_vm0, %v1132_v0 }
  0x50   : > { %229 = vst.msk [vmem:[#allocation2 + $0xe0] sm:$0xff] %vm200_vm0, %v1132_v0 }
  0x51   : > { %230 = vst.msk [vmem:[#allocation2 + $0xe8] sm:$0xff] %vm200_vm0, %v1132_v0 }
  0x52   : > { %231 = vst.msk [vmem:[#allocation2 + $0xf0] sm:$0xff] %vm200_vm0, %v1132_v0 }
  0x53   : > { %232 = vst.msk [vmem:[#allocation2 + $0xf8] sm:$0xff] %vm200_vm0, %v1132_v0 }
  0x54   : > { %233 = vst.msk [vmem:[#allocation2 + $0x100] sm:$0xff] %vm200_vm0, %v1132_v0 }
  0x55   : > { %234 = vst.msk [vmem:[#allocation2 + $0x108] sm:$0xff] %vm200_vm0, %v1132_v0 }
  0x56   : > { %235 = vst.msk [vmem:[#allocation2 + $0x110] sm:$0xff] %vm200_vm0, %v1132_v0 }
  0x57   : > { %236 = vst.msk [vmem:[#allocation2 + $0x118] sm:$0xff] %vm200_vm0, %v1132_v0 }
  0x58   : > { %237 = vst.msk [vmem:[#allocation2 + $0x120] sm:$0xff] %vm200_vm0, %v1132_v0 }
  0x59   : > { %238 = vst.msk [vmem:[#allocation2 + $0x128] sm:$0xff] %vm200_vm0, %v1132_v0 }
  0x5a   : > { %239 = vst.msk [vmem:[#allocation2 + $0x130] sm:$0xff] %vm200_vm0, %v1132_v0 }
  0x5b   : > { %240 = vst.msk [vmem:[#allocation2 + $0x138] sm:$0xff] %vm200_vm0, %v1132_v0 }
  0x5c   : > { %241 = vst.msk [vmem:[#allocation2 + $0x140] sm:$0xff] %vm200_vm0, %v1132_v0 }
  0x5d   : > { %242 = vst.msk [vmem:[#allocation2 + $0x148] sm:$0xff] %vm200_vm0, %v1132_v0 }
  0x5e   : > { %243 = vst.msk [vmem:[#allocation2 + $0x150] sm:$0xff] %vm200_vm0, %v1132_v0 }
  0x5f   : > { %244 = vst.msk [vmem:[#allocation2 + $0x158] sm:$0xff] %vm200_vm0, %v1132_v0 }
  0x60   : > { %245 = vst.msk [vmem:[#allocation2 + $0x160] sm:$0xff] %vm200_vm0, %v1132_v0 }
  0x61   : > { %246 = vst.msk [vmem:[#allocation2 + $0x168] sm:$0xff] %vm200_vm0, %v1132_v0 }
  0x62   : > { %247 = vst.msk [vmem:[#allocation2 + $0x170] sm:$0xff] %vm200_vm0, %v1132_v0 }
  0x63   : > { %248 = vst.msk [vmem:[#allocation2 + $0x178] sm:$0xff] %vm200_vm0, %v1132_v0 }
  0x64 PF: > { %v1320_v1 = vld [vmem:[%s1253_s17 + $0x178] sm:$0xff]  ;;  %v1323_v2 = vld [vmem:[%s1253_s17 + $0x170] sm:$0xff]  ;;  %v1338_v6 = vld [vmem:[%s1253_s17 + $0x168] sm:$0xff]  ;;  %vm647_vm5 = vcmask 64512   ;;  %p896_p3 = scmp.ne.s32.totalorder %s1110_s12, 1 }
  0x65   : > { %1738 = vst [vmem:[#allocation11_spill] sm:$0xff] %v1320_v1  ;;  %v1326_v3 = vld [vmem:[%s1253_s17 + $0x78] sm:$0xff]  ;;  %340 = vmatpush.msra.mxu2 %v1320_v1  ;;  %v1334_v5 = vld [vmem:[%s1253_s17 + $0x70] sm:$0xff]  ;;  %v1344_v8 = vld [vmem:[%s1253_s17 + $0x68] sm:$0xff] }
  0x66   : > { %1739 = vst [vmem:[#allocation12_spill] sm:$0xff] %v1323_v2  ;;  %300 = vmatpush.msra.mxu0 %v1326_v3  ;;  %v1331_v4 = vld [vmem:[%s1253_s17 + $0xf8] sm:$0xff]  ;;  %v1341_v7 = vld [vmem:[%s1253_s17 + $0xf0] sm:$0xff]  ;;  %v1349_v9 = vld [vmem:[%s1253_s17 + $0xe8] sm:$0xff] }
  0x67   : > { %320 = vmatpush.msra.mxu1 %v1331_v4  ;;  %1740 = vst [vmem:[#allocation13_spill] sm:$0xff] %v1338_v6  ;;  %341 = vmatpush.msra.mxu2 %v1323_v2  ;;  %v1353_v10 = vld [vmem:[%s1253_s17 + $0x160] sm:$0xff]  ;;  %v1365_v13 = vld [vmem:[%s1253_s17 + $0x158] sm:$0xff]  ;;  %v1377_v16 = vld [vmem:[%s1253_s17 + $0x150] sm:$0xff] }
  0x68   : > { %301 = vmatpush.msra.mxu0 %v1334_v5  ;;  %1741 = vst [vmem:[#allocation14_spill] sm:$0xff] %v1353_v10  ;;  %v1356_v11 = vld [vmem:[%s1253_s17 + $0x60] sm:$0xff]  ;;  %v1368_v14 = vld [vmem:[%s1253_s17 + $0x58] sm:$0xff]  ;;  %v1380_v17 = vld [vmem:[%s1253_s17 + $0x50] sm:$0xff] }
  0x69   : > { %321 = vmatpush.msra.mxu1 %v1341_v7  ;;  %342 = vmatpush.msra.mxu2 %v1338_v6  ;;  %v1361_v12 = vld [vmem:[%s1253_s17 + $0xe0] sm:$0xff]  ;;  %v1373_v15 = vld [vmem:[%s1253_s17 + $0xd8] sm:$0xff]  ;;  %v1385_v18 = vld [vmem:[%s1253_s17 + $0xd0] sm:$0xff] }
  0x6a   : > { %302 = vmatpush.msra.mxu0 %v1344_v8  ;;  %v1389_v19 = vld [vmem:[%s1253_s17 + $0x148] sm:$0xff]  ;;  %v1401_v22 = vld [vmem:[%s1253_s17 + $0x140] sm:$0xff]  ;;  %v1413_v25 = vld [vmem:[%s1253_s17 + $0x138] sm:$0xff] }
  0x6b   : > { %322 = vmatpush.msra.mxu1 %v1349_v9  ;;  %343 = vmatpush.msra.mxu2 %v1353_v10  ;;  %v1392_v20 = vld [vmem:[%s1253_s17 + $0x48] sm:$0xff]  ;;  %v1404_v23 = vld [vmem:[%s1253_s17 + $0x40] sm:$0xff]  ;;  %v1416_v26 = vld [vmem:[%s1253_s17 + $0x38] sm:$0xff] }
  0x6c   : > { %303 = vmatpush.msra.mxu0 %v1356_v11  ;;  %v1397_v21 = vld [vmem:[%s1253_s17 + $0xc8] sm:$0xff]  ;;  %v1409_v24 = vld [vmem:[%s1253_s17 + $0xc0] sm:$0xff]  ;;  %v1421_v27 = vld [vmem:[%s1253_s17 + $0xb8] sm:$0xff] }
  0x6d   : > { %323 = vmatpush.msra.mxu1 %v1361_v12  ;;  %344 = vmatpush.msra.mxu2 %v1365_v13  ;;  %v1425_v28 = vld [vmem:[%s1253_s17 + $0x130] sm:$0xff]  ;;  %v1437_v31 = vld [vmem:[%s1253_s17 + $0x128] sm:$0xff]  ;;  %v1449_v34 = vld [vmem:[%s1253_s17 + $0x120] sm:$0xff] }
  0x6e   : > { %304 = vmatpush.msra.mxu0 %v1368_v14  ;;  %v1428_v29 = vld [vmem:[%s1253_s17 + $0x30] sm:$0xff]  ;;  %v1440_v32 = vld [vmem:[%s1253_s17 + $0x28] sm:$0xff]  ;;  %v1452_v35 = vld [vmem:[%s1253_s17 + $0x20] sm:$0xff] }
  0x6f   : > { %324 = vmatpush.msra.mxu1 %v1373_v15  ;;  %345 = vmatpush.msra.mxu2 %v1377_v16  ;;  %v1433_v30 = vld [vmem:[%s1253_s17 + $0xb0] sm:$0xff]  ;;  %v1445_v33 = vld [vmem:[%s1253_s17 + $0xa8] sm:$0xff]  ;;  %v1457_v36 = vld [vmem:[%s1253_s17 + $0xa0] sm:$0xff] }
  0x70   : > { %305 = vmatpush.msra.mxu0 %v1380_v17  ;;  %v1461_v37 = vld [vmem:[%s1253_s17 + $0x118] sm:$0xff]  ;;  %v1473_v40 = vld [vmem:[%s1253_s17 + $0x110] sm:$0xff]  ;;  %v1485_v43 = vld [vmem:[%s1253_s17 + $0x108] sm:$0xff] }
  0x71   : > { %325 = vmatpush.msra.mxu1 %v1385_v18  ;;  %346 = vmatpush.msra.mxu2 %v1389_v19  ;;  %v1464_v38 = vld [vmem:[%s1253_s17 + $0x18] sm:$0xff]  ;;  %v1476_v41 = vld [vmem:[%s1253_s17 + $0x10] sm:$0xff]  ;;  %v1488_v44 = vld [vmem:[%s1253_s17 + $0x8] sm:$0xff] }
  0x72   : > { %306 = vmatpush.msra.mxu0 %v1392_v20  ;;  %v1469_v39 = vld [vmem:[%s1253_s17 + $0x98] sm:$0xff]  ;;  %v1481_v42 = vld [vmem:[%s1253_s17 + $0x90] sm:$0xff]  ;;  %v1493_v45 = vld [vmem:[%s1253_s17 + $0x88] sm:$0xff] }
  0x73   : > { %326 = vmatpush.msra.mxu1 %v1397_v21  ;;  %347 = vmatpush.msra.mxu2 %v1401_v22  ;;  %v281_v46 = vld [vmem:[%s1253_s17 + $0x100] sm:$0xff]  ;;  %v299_v48 = vld [vmem:[#allocation5 + $0x10] sm:$0xff]  ;;  %v298_v51 = vld [vmem:[#allocation5 + $0x8] sm:$0xff] }
  0x74   : > { %307 = vmatpush.msra.mxu0 %v1404_v23  ;;  %v249_v47 = vld [vmem:[%s1253_s17] sm:$0xff] }
  0x75   : > { %327 = vmatpush.msra.mxu1 %v1409_v24  ;;  %348 = vmatpush.msra.mxu2 %v1413_v25  ;;  %v1501_v49 = vld [vmem:[%s1253_s17 + $0x80] sm:$0xff] }
  0x76   : > { %308 = vmatpush.msra.mxu0 %v1416_v26  ;;  %v297_v50 = vld [vmem:[#allocation5] sm:$0xff] }
  0x77   : > { %328 = vmatpush.msra.mxu1 %v1421_v27  ;;  %349 = vmatpush.msra.mxu2 %v1425_v28 }
  0x78   : > { %309 = vmatpush.msra.mxu0 %v1428_v29 }
  0x79   : > { %329 = vmatpush.msra.mxu1 %v1433_v30  ;;  %350 = vmatpush.msra.mxu2 %v1437_v31 }
  0x7a   : > { %310 = vmatpush.msra.mxu0 %v1440_v32 }
  0x7b   : > { %330 = vmatpush.msra.mxu1 %v1445_v33  ;;  %351 = vmatpush.msra.mxu2 %v1449_v34 }
  0x7c   : > { %311 = vmatpush.msra.mxu0 %v1452_v35 }
  0x7d   : > { %331 = vmatpush.msra.mxu1 %v1457_v36  ;;  %352 = vmatpush.msra.mxu2 %v1461_v37 }
  0x7e   : > { %312 = vmatpush.msra.mxu0 %v1464_v38 }
  0x7f   : > { %332 = vmatpush.msra.mxu1 %v1469_v39  ;;  %353 = vmatpush.msra.mxu2 %v1473_v40 }
  0x80   : > { %313 = vmatpush.msra.mxu0 %v1476_v41 }
  0x81   : > { %333 = vmatpush.msra.mxu1 %v1481_v42  ;;  %354 = vmatpush.msra.mxu2 %v1485_v43 }
  0x82   : > { %314 = vmatpush.msra.mxu0 %v1488_v44 }
  0x83   : > { %334 = vmatpush.msra.mxu1 %v1493_v45  ;;  %355 = vmatpush.msra.mxu2 %v281_v46 }
  0x84   : > { %315 = vmatpush.msra.mxu0 %v249_v47  ;;  %356 = vmatmul.f32.vlgmr.msra.gmra.mxu2 %v299_v48 }
  0x85   : > { %335 = vmatpush.msra.mxu1 %v1501_v49  ;;  %316 = vmatmul.f32.vlgmr.msra.gmra.mxu0 %v297_v50 }
  0x86   : > { %336 = vmatmul.f32.vlgmr.msra.gmra.mxu1 %v298_v51 }
 0x102   : > { %v317_v52 = vpop.f32.mrf.mxu0 }
 0x103   : > { %v337_v53 = vpop.f32.mrf.mxu1 }
 0x104   : > { %v338_v54 = vadd.f32 %v337_v53, %v317_v52 }
 0x107   : > { %v357_v55 = vpop.f32.mrf.mxu2 }
 0x108   : > { %v358_v56 = vadd.f32 %v357_v55, %v338_v54 }
 0x10a   : > { %v360_v57 = vrot.slane %v358_v56, 4 }
 0x10c   : > { %v361_v58 = vmax.f32 %v358_v56, %v360_v57 }
 0x10e   : > { %v362_v59 = vrot.slane %v361_v58, 2 }
 0x110   : > { %v363_v60 = vmax.f32 %v361_v58, %v362_v59 }
 0x112   : > { %v364_v61 = vrot.slane %v363_v60, 1 }
 0x114   : > { %v365_v62 = vmax.f32 %v363_v60, %v364_v61 }
 0x116   : > { %v366_v63 = vsub.f32 %v358_v56, %v365_v62 }
 0x118   : > { %v367_v0 = vmul.f32 1.442695, %v366_v63 }
 0x11a   : > { %992 = vpow2.f32 %v367_v0  ;;  %v426_v0 = vld [vmem:[#allocation2 + $0x120] sm:$0xff] }
 0x120   : > { %v993_v1 = vpop.eup %992 }
 0x121   : > { %v369_v48 = vrot.slane %v993_v1, 4 }
 0x123   : > { %v370_v2 = vadd.f32 %v993_v1, %v369_v48 }
 0x125   : > { %v371_v6 = vrot.slane %v370_v2, 2 }
 0x127   : > { %v372_v50 = vadd.f32 %v371_v6, %v370_v2  ;;  %v1743_v2 = vld [vmem:[#allocation13_spill] sm:$0xff]  ;;  %v422_v6 = vld [vmem:[#allocation2 + $0x100] sm:$0xff] }
 0x129   : > { %v373_v51 = vrot.slane %v372_v50, 1 }
 0x12b   : > { %v374_v10 = vadd.f32 %v373_v51, %v372_v50  ;;  %v394_v51 = vld [vmem:[#allocation2 + $0x20] sm:$0xff] }
 0x12d   : > { %994 = vrcp.f32 %v374_v10  ;;  %v386_v55 = vand.u32 2147483648, %v374_v10  ;;  %v384_v58 = vand.u32 2147483647, %v374_v10  ;;  %vm380_vm2 = vweird.f32 %v374_v10 }
 0x12f   : > { %v387_v56 = vor.u32 1.1754944e-38, %v386_v55  ;;  %vm385_vm4 = vcmp.eq.f32.partialorder %v384_v58, 8.507059e+37  ;;  %v415_v55 = vld [vmem:[#allocation2 + $0xc8] sm:$0xff] }
 0x133   : > { %v995_v52 = vpop.eup %994 }
 0x134   : > { %v376_v53 = vmul.f32 %v995_v52, %v374_v10  ;;  %vm381_vm1 = vweird.f32 %v995_v52  ;;  %v401_v10 = vld [vmem:[#allocation2 + $0x58] sm:$0xff] }
 0x135   : > { %vm382_vm3 = vmor %vm380_vm2, %vm381_vm1 }
 0x136   : > { %v377_v54 = vsub.f32 1.0, %v376_v53  ;;  %v405_v53 = vld [vmem:[#allocation2 + $0x78] sm:$0xff] }
 0x138   : > { %v378_v57 = vmul.f32 %v995_v52, %v377_v54 }
 0x13a   : > { %v379_v59 = vadd.f32 %v995_v52, %v378_v57 }
 0x13c   : > { %v383_v60 = vsel %vm382_vm3, %v995_v52, %v379_v59 }
 0x13d   : > { %v388_v61 = vsel %vm385_vm4, %v387_v56, %v383_v60  ;;  %v427_v60 = vld [vmem:[#allocation2 + $0x128] sm:$0xff] }
 0x13e   : > { %v389_v62 = vmul.f32 %v993_v1, %v388_v61  ;;  %v1742_v1 = vld [vmem:[#allocation14_spill] sm:$0xff] }
 0x140   : > { %453 = vmatpush.xpose.msrb.mxu0 %v389_v62  ;;  %899 = vmatpush.xpose.msrb.mxu1 %v389_v62 }
 0x141   : > { %900 = vmatpush.xpose.msrb.mxu2 %v389_v62  ;;  %901 = vmatpush.xpose.msra.mxu3 %v389_v62 }
 0x143   : > { %454 = vmatmul.f32.vlgmr.msrb.gmra.mxu0 %v249_v47  ;;  %487 = vmatmul.f32.vlgmr.msrb.gmra.mxu1 %v1368_v14  ;;  %v423_v14 = vld [vmem:[#allocation2 + $0x108] sm:$0xff] }
 0x144   : > { %550 = vmatmul.f32.vlgmr.msra.gmra.mxu3 %v281_v46  ;;  %520 = vmatmul.f32.vlgmr.msrb.gmra.mxu2 %v1433_v30 }
 0x14b   : > { %457 = vmatmul.f32.gmra.mxu0 %v1488_v44  ;;  %490 = vmatmul.f32.gmra.mxu1 %v1356_v11 }
 0x14c   : > { %553 = vmatmul.f32.gmra.mxu3 %v1485_v43  ;;  %523 = vmatmul.f32.gmra.mxu2 %v1421_v27  ;;  %v404_v43 = vld [vmem:[#allocation2 + $0x70] sm:$0xff] }
 0x153   : > { %460 = vmatmul.f32.gmra.mxu0 %v1476_v41  ;;  %493 = vmatmul.f32.gmra.mxu1 %v1344_v8  ;;  %v390_v8 = vld [vmem:[#allocation2] sm:$0xff]  ;;  %v393_v41 = vld [vmem:[#allocation2 + $0x18] sm:$0xff] }
 0x154   : > { %556 = vmatmul.f32.gmra.mxu3 %v1473_v40  ;;  %526 = vmatmul.f32.gmra.mxu2 %v1409_v24 }
 0x15b   : > { %463 = vmatmul.f32.gmra.mxu0 %v1464_v38  ;;  %496 = vmatmul.f32.gmra.mxu1 %v1334_v5  ;;  %v1745_v5 = vld [vmem:[#allocation11_spill] sm:$0xff] }
 0x15c   : > { %559 = vmatmul.f32.gmra.mxu3 %v1461_v37  ;;  %529 = vmatmul.f32.gmra.mxu2 %v1397_v21  ;;  %v412_v21 = vld [vmem:[#allocation2 + $0xb0] sm:$0xff]  ;;  %v425_v38 = vld [vmem:[#allocation2 + $0x118] sm:$0xff] }
 0x163   : > { %466 = vmatmul.f32.gmra.mxu0 %v1452_v35  ;;  %499 = vmatmul.f32.gmra.mxu1 %v1326_v3  ;;  %v1744_v3 = vld [vmem:[#allocation12_spill] sm:$0xff] }
 0x164   : > { %562 = vmatmul.f32.gmra.mxu3 %v1449_v34  ;;  %532 = vmatmul.f32.gmra.mxu2 %v1385_v18 }
 0x16b   : > { %469 = vmatmul.f32.gmra.mxu0 %v1440_v32  ;;  %502 = vmatmul.f32.gmra.mxu1 %v1501_v49 }
 0x16c   : > { %565 = vmatmul.f32.gmra.mxu3 %v1437_v31  ;;  %535 = vmatmul.f32.gmra.mxu2 %v1373_v15  ;;  %v403_v31 = vld [vmem:[#allocation2 + $0x68] sm:$0xff] }
 0x173   : > { %472 = vmatmul.f32.gmra.mxu0 %v1428_v29  ;;  %505 = vmatmul.f32.gmra.mxu1 %v1493_v45  ;;  %v392_v29 = vld [vmem:[#allocation2 + $0x10] sm:$0xff]  ;;  %v414_v45 = vld [vmem:[#allocation2 + $0xc0] sm:$0xff] }
 0x174   : > { %568 = vmatmul.f32.gmra.mxu3 %v1425_v28  ;;  %538 = vmatmul.f32.gmra.mxu2 %v1361_v12 }
 0x17b   : > { %475 = vmatmul.f32.gmra.mxu0 %v1416_v26  ;;  %508 = vmatmul.f32.gmra.mxu1 %v1481_v42  ;;  %v424_v26 = vld [vmem:[#allocation2 + $0x110] sm:$0xff] }
 0x17c   : > { %571 = vmatmul.f32.gmra.mxu3 %v1413_v25  ;;  %541 = vmatmul.f32.gmra.mxu2 %v1349_v9 }
 0x183   : > { %478 = vmatmul.f32.gmra.mxu0 %v1404_v23  ;;  %511 = vmatmul.f32.gmra.mxu1 %v1469_v39 }
 0x184   : > { %574 = vmatmul.f32.gmra.mxu3 %v1401_v22  ;;  %544 = vmatmul.f32.gmra.mxu2 %v1341_v7 }
 0x18b   : > { %481 = vmatmul.f32.gmra.mxu0 %v1392_v20  ;;  %514 = vmatmul.f32.gmra.mxu1 %v1457_v36 }
 0x18c   : > { %577 = vmatmul.f32.gmra.mxu3 %v1389_v19  ;;  %547 = vmatmul.f32.gmra.mxu2 %v1331_v4  ;;  %v402_v19 = vld [vmem:[#allocation2 + $0x60] sm:$0xff] }
 0x193   : > { %484 = vmatmul.f32.gmra.mxu0 %v1380_v17  ;;  %517 = vmatmul.f32.gmra.mxu1 %v1445_v33  ;;  %v391_v17 = vld [vmem:[#allocation2 + $0x8] sm:$0xff]  ;;  %v413_v33 = vld [vmem:[#allocation2 + $0xb8] sm:$0xff] }
 0x194   : > { %580 = vmatmul.f32.gmra.mxu3 %v1377_v16 }
 0x19c   : > { %583 = vmatmul.f32.gmra.mxu3 %v1365_v13 }
 0x1a4   : > { %586 = vmatmul.f32.gmra.mxu3 %v1742_v1  ;;  %v395_v1 = vld [vmem:[#allocation2 + $0x28] sm:$0xff] }
 0x1ac   : > { %589 = vmatmul.f32.gmra.mxu3 %v1743_v2 }
 0x1b4   : > { %592 = vmatmul.f32.gmra.mxu3 %v1744_v3  ;;  %v406_v3 = vld [vmem:[#allocation2 + $0x80] sm:$0xff] }
 0x1bc   : > { %595 = vmatmul.f32.gmra.mxu3 %v1745_v5 }
 0x1c0   : > { %v455_v9 = vpop.f32.mrf.mxu0  ;;  %v488_v11 = vpop.f32.mrf.mxu1 }
 0x1c1   : > { %v599_v12 = vadd.f32 %v455_v9, %v390_v8  ;;  %v610_v13 = vadd.f32 %v488_v11, %v401_v10  ;;  %v428_v10 = vld [vmem:[#allocation2 + $0x130] sm:$0xff] }
 0x1c3   : > { %648 = vst.msk [vmem:[#allocation2] sm:$0xff] %vm647_vm5, %v599_v12 }
 0x1c4   : > { %659 = vst.msk [vmem:[#allocation2 + $0x58] sm:$0xff] %vm647_vm5, %v610_v13  ;;  %v396_v13 = vld [vmem:[#allocation2 + $0x30] sm:$0xff] }
 0x1c7   : > { %v551_v7 = vpop.f32.mrf.mxu3  ;;  %v521_v24 = vpop.f32.mrf.mxu2 }
 0x1c8   : > { %v631_v4 = vadd.f32 %v551_v7, %v422_v6  ;;  %v458_v18 = vpop.f32.mrf.mxu0  ;;  %v491_v20 = vpop.f32.mrf.mxu1  ;;  %v621_v25 = vadd.f32 %v521_v24, %v412_v21  ;;  %v416_v6 = vld [vmem:[#allocation2 + $0xd0] sm:$0xff] }
 0x1c9   : > { %v600_v22 = vadd.f32 %v458_v18, %v391_v17  ;;  %v611_v23 = vadd.f32 %v491_v20, %v402_v19  ;;  %v417_v17 = vld [vmem:[#allocation2 + $0xd8] sm:$0xff] }
 0x1ca   : > { %680 = vst.msk [vmem:[#allocation2 + $0x100] sm:$0xff] %vm647_vm5, %v631_v4 }
 0x1cb   : > { %649 = vst.msk [vmem:[#allocation2 + $0x8] sm:$0xff] %vm647_vm5, %v600_v22  ;;  %v429_v22 = vld [vmem:[#allocation2 + $0x138] sm:$0xff] }
 0x1cc   : > { %660 = vst.msk [vmem:[#allocation2 + $0x60] sm:$0xff] %vm647_vm5, %v611_v23 }
 0x1cd   : > { %670 = vst.msk [vmem:[#allocation2 + $0xb0] sm:$0xff] %vm647_vm5, %v621_v25  ;;  %v397_v25 = vld [vmem:[#allocation2 + $0x38] sm:$0xff] }
 0x1cf   : > { %v554_v15 = vpop.f32.mrf.mxu3  ;;  %v524_v36 = vpop.f32.mrf.mxu2 }
 0x1d0   : > { %v632_v16 = vadd.f32 %v554_v15, %v423_v14  ;;  %v461_v30 = vpop.f32.mrf.mxu0  ;;  %v494_v32 = vpop.f32.mrf.mxu1  ;;  %v622_v37 = vadd.f32 %v524_v36, %v413_v33  ;;  %v407_v15 = vld [vmem:[#allocation2 + $0x88] sm:$0xff] }
 0x1d1   : > { %v601_v34 = vadd.f32 %v461_v30, %v392_v29  ;;  %v612_v35 = vadd.f32 %v494_v32, %v403_v31  ;;  %v418_v29 = vld [vmem:[#allocation2 + $0xe0] sm:$0xff] }
 0x1d2   : > { %681 = vst.msk [vmem:[#allocation2 + $0x108] sm:$0xff] %vm647_vm5, %v632_v16 }
 0x1d3   : > { %650 = vst.msk [vmem:[#allocation2 + $0x10] sm:$0xff] %vm647_vm5, %v601_v34  ;;  %v430_v34 = vld [vmem:[#allocation2 + $0x140] sm:$0xff] }
 0x1d4   : > { %661 = vst.msk [vmem:[#allocation2 + $0x68] sm:$0xff] %vm647_vm5, %v612_v35 }
 0x1d5   : > { %671 = vst.msk [vmem:[#allocation2 + $0xb8] sm:$0xff] %vm647_vm5, %v622_v37  ;;  %v398_v37 = vld [vmem:[#allocation2 + $0x40] sm:$0xff] }
 0x1d7   : > { %v557_v27 = vpop.f32.mrf.mxu3  ;;  %v527_v49 = vpop.f32.mrf.mxu2 }
 0x1d8   : > { %v633_v28 = vadd.f32 %v557_v27, %v424_v26  ;;  %v464_v42 = vpop.f32.mrf.mxu0  ;;  %v497_v44 = vpop.f32.mrf.mxu1  ;;  %v623_v63 = vadd.f32 %v527_v49, %v414_v45  ;;  %v408_v27 = vld [vmem:[#allocation2 + $0x90] sm:$0xff] }
 0x1d9   : > { %v602_v46 = vadd.f32 %v464_v42, %v393_v41  ;;  %v613_v47 = vadd.f32 %v497_v44, %v404_v43  ;;  %v419_v41 = vld [vmem:[#allocation2 + $0xe8] sm:$0xff] }
 0x1da   : > { %682 = vst.msk [vmem:[#allocation2 + $0x110] sm:$0xff] %vm647_vm5, %v633_v28 }
 0x1db   : > { %651 = vst.msk [vmem:[#allocation2 + $0x18] sm:$0xff] %vm647_vm5, %v602_v46  ;;  %v431_v46 = vld [vmem:[#allocation2 + $0x148] sm:$0xff] }
 0x1dc   : > { %662 = vst.msk [vmem:[#allocation2 + $0x70] sm:$0xff] %vm647_vm5, %v613_v47 }
 0x1dd   : > { %672 = vst.msk [vmem:[#allocation2 + $0xc0] sm:$0xff] %vm647_vm5, %v623_v63  ;;  %v399_v63 = vld [vmem:[#allocation2 + $0x48] sm:$0xff] }
 0x1df   : > { %v560_v39 = vpop.f32.mrf.mxu3  ;;  %v530_v59 = vpop.f32.mrf.mxu2 }
 0x1e0   : > { %v634_v40 = vadd.f32 %v560_v39, %v425_v38  ;;  %v467_v52 = vpop.f32.mrf.mxu0  ;;  %v500_v54 = vpop.f32.mrf.mxu1  ;;  %v624_v56 = vadd.f32 %v530_v59, %v415_v55  ;;  %v409_v39 = vld [vmem:[#allocation2 + $0x98] sm:$0xff] }
 0x1e1   : > { %v603_v57 = vadd.f32 %v467_v52, %v394_v51  ;;  %v614_v58 = vadd.f32 %v500_v54, %v405_v53  ;;  %v420_v51 = vld [vmem:[#allocation2 + $0xf0] sm:$0xff] }
 0x1e2   : > { %683 = vst.msk [vmem:[#allocation2 + $0x118] sm:$0xff] %vm647_vm5, %v634_v40 }
 0x1e3   : > { %652 = vst.msk [vmem:[#allocation2 + $0x20] sm:$0xff] %vm647_vm5, %v603_v57  ;;  %v432_v57 = vld [vmem:[#allocation2 + $0x150] sm:$0xff] }
 0x1e4   : > { %663 = vst.msk [vmem:[#allocation2 + $0x78] sm:$0xff] %vm647_vm5, %v614_v58 }
 0x1e5   : > { %673 = vst.msk [vmem:[#allocation2 + $0xc8] sm:$0xff] %vm647_vm5, %v624_v56  ;;  %v400_v56 = vld [vmem:[#allocation2 + $0x50] sm:$0xff] }
 0x1e7   : > { %v563_v48 = vpop.f32.mrf.mxu3  ;;  %v533_v8 = vpop.f32.mrf.mxu2 }
 0x1e8   : > { %v635_v50 = vadd.f32 %v563_v48, %v426_v0  ;;  %v470_v2 = vpop.f32.mrf.mxu0  ;;  %v503_v5 = vpop.f32.mrf.mxu1  ;;  %v625_v9 = vadd.f32 %v533_v8, %v416_v6  ;;  %v410_v48 = vld [vmem:[#allocation2 + $0xa0] sm:$0xff] }
 0x1e9   : > { %v604_v7 = vadd.f32 %v470_v2, %v395_v1  ;;  %v615_v4 = vadd.f32 %v503_v5, %v406_v3  ;;  %v421_v1 = vld [vmem:[#allocation2 + $0xf8] sm:$0xff] }
 0x1ea   : > { %684 = vst.msk [vmem:[#allocation2 + $0x120] sm:$0xff] %vm647_vm5, %v635_v50 }
 0x1eb   : > { %653 = vst.msk [vmem:[#allocation2 + $0x28] sm:$0xff] %vm647_vm5, %v604_v7  ;;  %v433_v7 = vld [vmem:[#allocation2 + $0x158] sm:$0xff] }
 0x1ec   : > { %664 = vst.msk [vmem:[#allocation2 + $0x80] sm:$0xff] %vm647_vm5, %v615_v4 }
 0x1ed   : > { %674 = vst.msk [vmem:[#allocation2 + $0xd0] sm:$0xff] %vm647_vm5, %v625_v9  ;;  %v434_v9 = vld [vmem:[#allocation2 + $0x160] sm:$0xff] }
 0x1ef   : > { %v566_v61 = vpop.f32.mrf.mxu3  ;;  %v536_v20 = vpop.f32.mrf.mxu2 }
 0x1f0   : > { %v636_v62 = vadd.f32 %v566_v61, %v427_v60  ;;  %v473_v14 = vpop.f32.mrf.mxu0  ;;  %v506_v16 = vpop.f32.mrf.mxu1  ;;  %v626_v21 = vadd.f32 %v536_v20, %v417_v17  ;;  %v411_v61 = vld [vmem:[#allocation2 + $0xa8] sm:$0xff] }
 0x1f1   : > { %v605_v18 = vadd.f32 %v473_v14, %v396_v13  ;;  %v616_v19 = vadd.f32 %v506_v16, %v407_v15  ;;  %v436_v15 = vld [vmem:[#allocation2 + $0x170] sm:$0xff] }
 0x1f2   : > { %685 = vst.msk [vmem:[#allocation2 + $0x128] sm:$0xff] %vm647_vm5, %v636_v62 }
 0x1f3   : > { %654 = vst.msk [vmem:[#allocation2 + $0x30] sm:$0xff] %vm647_vm5, %v605_v18  ;;  %v437_v18 = vld [vmem:[#allocation2 + $0x178] sm:$0xff] }
 0x1f4   : > { %665 = vst.msk [vmem:[#allocation2 + $0x88] sm:$0xff] %vm647_vm5, %v616_v19 }
 0x1f5   : > { %675 = vst.msk [vmem:[#allocation2 + $0xd8] sm:$0xff] %vm647_vm5, %v626_v21 }
 0x1f7   : > { %v569_v11 = vpop.f32.mrf.mxu3  ;;  %v539_v32 = vpop.f32.mrf.mxu2 }
 0x1f8   : > { %v637_v12 = vadd.f32 %v569_v11, %v428_v10  ;;  %v476_v26 = vpop.f32.mrf.mxu0  ;;  %v509_v28 = vpop.f32.mrf.mxu1  ;;  %v627_v33 = vadd.f32 %v539_v32, %v418_v29 }
 0x1f9   : > { %v606_v30 = vadd.f32 %v476_v26, %v397_v25  ;;  %v617_v31 = vadd.f32 %v509_v28, %v408_v27 }
 0x1fa   : > { %686 = vst.msk [vmem:[#allocation2 + $0x130] sm:$0xff] %vm647_vm5, %v637_v12  ;;  %v435_v12 = vld [vmem:[#allocation2 + $0x168] sm:$0xff] }
 0x1fb   : > { %655 = vst.msk [vmem:[#allocation2 + $0x38] sm:$0xff] %vm647_vm5, %v606_v30 }
 0x1fc   : > { %666 = vst.msk [vmem:[#allocation2 + $0x90] sm:$0xff] %vm647_vm5, %v617_v31 }
 0x1fd   : > { %676 = vst.msk [vmem:[#allocation2 + $0xe0] sm:$0xff] %vm647_vm5, %v627_v33 }
 0x1ff   : > { %v572_v23 = vpop.f32.mrf.mxu3  ;;  %v542_v44 = vpop.f32.mrf.mxu2 }
 0x200   : > { %v638_v24 = vadd.f32 %v572_v23, %v429_v22  ;;  %v479_v38 = vpop.f32.mrf.mxu0  ;;  %v512_v40 = vpop.f32.mrf.mxu1  ;;  %v628_v45 = vadd.f32 %v542_v44, %v419_v41 }
 0x201   : > { %v607_v42 = vadd.f32 %v479_v38, %v398_v37  ;;  %v618_v43 = vadd.f32 %v512_v40, %v409_v39 }
 0x202   : > { %687 = vst.msk [vmem:[#allocation2 + $0x138] sm:$0xff] %vm647_vm5, %v638_v24 }
 0x203   : > { %656 = vst.msk [vmem:[#allocation2 + $0x40] sm:$0xff] %vm647_vm5, %v607_v42 }
 0x204   : > { %667 = vst.msk [vmem:[#allocation2 + $0x98] sm:$0xff] %vm647_vm5, %v618_v43 }
 0x205   : > { %677 = vst.msk [vmem:[#allocation2 + $0xe8] sm:$0xff] %vm647_vm5, %v628_v45 }
 0x207   : > { %v575_v35 = vpop.f32.mrf.mxu3  ;;  %v545_v54 = vpop.f32.mrf.mxu2 }
 0x208   : > { %v639_v36 = vadd.f32 %v575_v35, %v430_v34  ;;  %v482_v0 = vpop.f32.mrf.mxu0  ;;  %v515_v50 = vpop.f32.mrf.mxu1  ;;  %v629_v55 = vadd.f32 %v545_v54, %v420_v51 }
 0x209   : > { %v608_v52 = vadd.f32 %v482_v0, %v399_v63  ;;  %v619_v53 = vadd.f32 %v515_v50, %v410_v48 }
 0x20a   : > { %688 = vst.msk [vmem:[#allocation2 + $0x140] sm:$0xff] %vm647_vm5, %v639_v36 }
 0x20b   : > { %657 = vst.msk [vmem:[#allocation2 + $0x48] sm:$0xff] %vm647_vm5, %v608_v52 }
 0x20c   : > { %668 = vst.msk [vmem:[#allocation2 + $0xa0] sm:$0xff] %vm647_vm5, %v619_v53 }
 0x20d   : > { %678 = vst.msk [vmem:[#allocation2 + $0xf0] sm:$0xff] %vm647_vm5, %v629_v55 }
 0x20f   : > { %v578_v47 = vpop.f32.mrf.mxu3  ;;  %v548_v5 = vpop.f32.mrf.mxu2 }
 0x210   : > { %v640_v49 = vadd.f32 %v578_v47, %v431_v46  ;;  %v485_v60 = vpop.f32.mrf.mxu0  ;;  %v518_v62 = vpop.f32.mrf.mxu1  ;;  %v630_v6 = vadd.f32 %v548_v5, %v421_v1 }
 0x211   : > { %v609_v2 = vadd.f32 %v485_v60, %v400_v56  ;;  %v620_v3 = vadd.f32 %v518_v62, %v411_v61 }
 0x212   : > { %689 = vst.msk [vmem:[#allocation2 + $0x148] sm:$0xff] %vm647_vm5, %v640_v49 }
 0x213   : > { %658 = vst.msk [vmem:[#allocation2 + $0x50] sm:$0xff] %vm647_vm5, %v609_v2 }
 0x214   : > { %669 = vst.msk [vmem:[#allocation2 + $0xa8] sm:$0xff] %vm647_vm5, %v620_v3 }
 0x215   : > { %679 = vst.msk [vmem:[#allocation2 + $0xf8] sm:$0xff] %vm647_vm5, %v630_v6 }
 0x217   : > { %v581_v58 = vpop.f32.mrf.mxu3 }
 0x218   : > { %v641_v59 = vadd.f32 %v581_v58, %v432_v57 }
 0x21a   : > { %690 = vst.msk [vmem:[#allocation2 + $0x150] sm:$0xff] %vm647_vm5, %v641_v59 }
 0x21f   : > { %v584_v4 = vpop.f32.mrf.mxu3 }
 0x220   : > { %v642_v8 = vadd.f32 %v584_v4, %v433_v7 }
 0x222   : > { %691 = vst.msk [vmem:[#allocation2 + $0x158] sm:$0xff] %vm647_vm5, %v642_v8 }
 0x227   : > { %v587_v10 = vpop.f32.mrf.mxu3 }
 0x228   : > { %v643_v11 = vadd.f32 %v587_v10, %v434_v9 }
 0x22a   : > { %692 = vst.msk [vmem:[#allocation2 + $0x160] sm:$0xff] %vm647_vm5, %v643_v11 }
 0x22f   : > { %v590_v13 = vpop.f32.mrf.mxu3 }
 0x230   : > { %v644_v14 = vadd.f32 %v590_v13, %v435_v12 }
 0x232   : > { %693 = vst.msk [vmem:[#allocation2 + $0x168] sm:$0xff] %vm647_vm5, %v644_v14 }
 0x237   : > { %v593_v16 = vpop.f32.mrf.mxu3 }
 0x238   : > { %v645_v17 = vadd.f32 %v593_v16, %v436_v15 }
 0x23a   : > { %694 = vst.msk [vmem:[#allocation2 + $0x170] sm:$0xff] %vm647_vm5, %v645_v17 }
 0x23e   : > { %699 = sbr.rel (%p896_p3) target bundleno = 628 (0x274), region = 44 }
 0x23f   : > { %v596_v19 = vpop.f32.mrf.mxu3 }
 0x240   : > { %v646_v20 = vadd.f32 %v596_v19, %v437_v18 }
 0x242   : > { %695 = vst.msk [vmem:[#allocation2 + $0x178] sm:$0xff] %vm647_vm5, %v646_v20 }
 0x243   : > { %v700_v21 = vld [vmem:[#allocation2] sm:$0xff]  ;;  %v701_v22 = vld [vmem:[#allocation2 + $0x8] sm:$0xff]  ;;  %v702_v23 = vld [vmem:[#allocation2 + $0x10] sm:$0xff] }
 0x244   : > { %748 = vst.msk [vmem:[%s1268_s28] sm:$0xff] %vm647_vm5, %v700_v21  ;;  %v703_v24 = vld [vmem:[#allocation2 + $0x18] sm:$0xff]  ;;  %v704_v25 = vld [vmem:[#allocation2 + $0x20] sm:$0xff]  ;;  %v705_v26 = vld [vmem:[#allocation2 + $0x28] sm:$0xff] }
 0x245   : > { %749 = vst.msk [vmem:[%s1268_s28 + $0x8] sm:$0xff] %vm647_vm5, %v701_v22  ;;  %v706_v27 = vld [vmem:[#allocation2 + $0x30] sm:$0xff]  ;;  %v707_v28 = vld [vmem:[#allocation2 + $0x38] sm:$0xff]  ;;  %v708_v29 = vld [vmem:[#allocation2 + $0x40] sm:$0xff] }
 0x246   : > { %750 = vst.msk [vmem:[%s1268_s28 + $0x10] sm:$0xff] %vm647_vm5, %v702_v23  ;;  %v709_v30 = vld [vmem:[#allocation2 + $0x48] sm:$0xff]  ;;  %v710_v31 = vld [vmem:[#allocation2 + $0x50] sm:$0xff]  ;;  %v711_v32 = vld [vmem:[#allocation2 + $0x58] sm:$0xff] }
 0x247   : > { %751 = vst.msk [vmem:[%s1268_s28 + $0x18] sm:$0xff] %vm647_vm5, %v703_v24  ;;  %v712_v33 = vld [vmem:[#allocation2 + $0x60] sm:$0xff]  ;;  %v713_v34 = vld [vmem:[#allocation2 + $0x68] sm:$0xff]  ;;  %v714_v35 = vld [vmem:[#allocation2 + $0x70] sm:$0xff] }
 0x248   : > { %752 = vst.msk [vmem:[%s1268_s28 + $0x20] sm:$0xff] %vm647_vm5, %v704_v25  ;;  %v715_v36 = vld [vmem:[#allocation2 + $0x78] sm:$0xff]  ;;  %v716_v37 = vld [vmem:[#allocation2 + $0x80] sm:$0xff]  ;;  %v717_v38 = vld [vmem:[#allocation2 + $0x88] sm:$0xff] }
 0x249   : > { %753 = vst.msk [vmem:[%s1268_s28 + $0x28] sm:$0xff] %vm647_vm5, %v705_v26  ;;  %v718_v39 = vld [vmem:[#allocation2 + $0x90] sm:$0xff]  ;;  %v719_v40 = vld [vmem:[#allocation2 + $0x98] sm:$0xff]  ;;  %v720_v41 = vld [vmem:[#allocation2 + $0xa0] sm:$0xff] }
 0x24a   : > { %754 = vst.msk [vmem:[%s1268_s28 + $0x30] sm:$0xff] %vm647_vm5, %v706_v27  ;;  %v721_v42 = vld [vmem:[#allocation2 + $0xa8] sm:$0xff]  ;;  %v722_v43 = vld [vmem:[#allocation2 + $0xb0] sm:$0xff]  ;;  %v723_v44 = vld [vmem:[#allocation2 + $0xb8] sm:$0xff] }
 0x24b   : > { %755 = vst.msk [vmem:[%s1268_s28 + $0x38] sm:$0xff] %vm647_vm5, %v707_v28  ;;  %v724_v45 = vld [vmem:[#allocation2 + $0xc0] sm:$0xff]  ;;  %v725_v46 = vld [vmem:[#allocation2 + $0xc8] sm:$0xff]  ;;  %v726_v47 = vld [vmem:[#allocation2 + $0xd0] sm:$0xff] }
 0x24c   : > { %756 = vst.msk [vmem:[%s1268_s28 + $0x40] sm:$0xff] %vm647_vm5, %v708_v29  ;;  %v727_v49 = vld [vmem:[#allocation2 + $0xd8] sm:$0xff]  ;;  %v728_v63 = vld [vmem:[#allocation2 + $0xe0] sm:$0xff]  ;;  %v729_v0 = vld [vmem:[#allocation2 + $0xe8] sm:$0xff] }
 0x24d   : > { %757 = vst.msk [vmem:[%s1268_s28 + $0x48] sm:$0xff] %vm647_vm5, %v709_v30  ;;  %v730_v48 = vld [vmem:[#allocation2 + $0xf0] sm:$0xff]  ;;  %v731_v50 = vld [vmem:[#allocation2 + $0xf8] sm:$0xff]  ;;  %v732_v51 = vld [vmem:[#allocation2 + $0x100] sm:$0xff] }
 0x24e   : > { %758 = vst.msk [vmem:[%s1268_s28 + $0x50] sm:$0xff] %vm647_vm5, %v710_v31  ;;  %v733_v52 = vld [vmem:[#allocation2 + $0x108] sm:$0xff]  ;;  %v734_v53 = vld [vmem:[#allocation2 + $0x110] sm:$0xff]  ;;  %v735_v54 = vld [vmem:[#allocation2 + $0x118] sm:$0xff] }
 0x24f   : > { %759 = vst.msk [vmem:[%s1268_s28 + $0x58] sm:$0xff] %vm647_vm5, %v711_v32  ;;  %v736_v55 = vld [vmem:[#allocation2 + $0x120] sm:$0xff]  ;;  %v737_v57 = vld [vmem:[#allocation2 + $0x128] sm:$0xff]  ;;  %v738_v58 = vld [vmem:[#allocation2 + $0x130] sm:$0xff] }
 0x250   : > { %760 = vst.msk [vmem:[%s1268_s28 + $0x60] sm:$0xff] %vm647_vm5, %v712_v33  ;;  %v739_v59 = vld [vmem:[#allocation2 + $0x138] sm:$0xff]  ;;  %v740_v56 = vld [vmem:[#allocation2 + $0x140] sm:$0xff]  ;;  %v741_v60 = vld [vmem:[#allocation2 + $0x148] sm:$0xff] }
 0x251   : > { %761 = vst.msk [vmem:[%s1268_s28 + $0x68] sm:$0xff] %vm647_vm5, %v713_v34  ;;  %v742_v61 = vld [vmem:[#allocation2 + $0x150] sm:$0xff]  ;;  %v743_v62 = vld [vmem:[#allocation2 + $0x158] sm:$0xff]  ;;  %v744_v1 = vld [vmem:[#allocation2 + $0x160] sm:$0xff] }
 0x252   : > { %762 = vst.msk [vmem:[%s1268_s28 + $0x70] sm:$0xff] %vm647_vm5, %v714_v35  ;;  %v745_v2 = vld [vmem:[#allocation2 + $0x168] sm:$0xff]  ;;  %v746_v3 = vld [vmem:[#allocation2 + $0x170] sm:$0xff]  ;;  %v747_v5 = vld [vmem:[#allocation2 + $0x178] sm:$0xff] }
 0x253   : > { %763 = vst.msk [vmem:[%s1268_s28 + $0x78] sm:$0xff] %vm647_vm5, %v715_v36 }
 0x254   : > { %764 = vst.msk [vmem:[%s1268_s28 + $0x80] sm:$0xff] %vm647_vm5, %v716_v37 }
 0x255   : > { %765 = vst.msk [vmem:[%s1268_s28 + $0x88] sm:$0xff] %vm647_vm5, %v717_v38 }
 0x256   : > { %766 = vst.msk [vmem:[%s1268_s28 + $0x90] sm:$0xff] %vm647_vm5, %v718_v39 }
 0x257   : > { %767 = vst.msk [vmem:[%s1268_s28 + $0x98] sm:$0xff] %vm647_vm5, %v719_v40 }
 0x258   : > { %768 = vst.msk [vmem:[%s1268_s28 + $0xa0] sm:$0xff] %vm647_vm5, %v720_v41 }
 0x259   : > { %769 = vst.msk [vmem:[%s1268_s28 + $0xa8] sm:$0xff] %vm647_vm5, %v721_v42 }
 0x25a   : > { %770 = vst.msk [vmem:[%s1268_s28 + $0xb0] sm:$0xff] %vm647_vm5, %v722_v43 }
 0x25b   : > { %771 = vst.msk [vmem:[%s1268_s28 + $0xb8] sm:$0xff] %vm647_vm5, %v723_v44 }
 0x25c   : > { %772 = vst.msk [vmem:[%s1268_s28 + $0xc0] sm:$0xff] %vm647_vm5, %v724_v45 }
 0x25d   : > { %773 = vst.msk [vmem:[%s1268_s28 + $0xc8] sm:$0xff] %vm647_vm5, %v725_v46 }
 0x25e   : > { %774 = vst.msk [vmem:[%s1268_s28 + $0xd0] sm:$0xff] %vm647_vm5, %v726_v47 }
 0x25f   : > { %775 = vst.msk [vmem:[%s1268_s28 + $0xd8] sm:$0xff] %vm647_vm5, %v727_v49 }
 0x260   : > { %776 = vst.msk [vmem:[%s1268_s28 + $0xe0] sm:$0xff] %vm647_vm5, %v728_v63 }
 0x261   : > { %777 = vst.msk [vmem:[%s1268_s28 + $0xe8] sm:$0xff] %vm647_vm5, %v729_v0 }
 0x262   : > { %778 = vst.msk [vmem:[%s1268_s28 + $0xf0] sm:$0xff] %vm647_vm5, %v730_v48 }
 0x263   : > { %779 = vst.msk [vmem:[%s1268_s28 + $0xf8] sm:$0xff] %vm647_vm5, %v731_v50 }
 0x264   : > { %780 = vst.msk [vmem:[%s1268_s28 + $0x100] sm:$0xff] %vm647_vm5, %v732_v51 }
 0x265   : > { %781 = vst.msk [vmem:[%s1268_s28 + $0x108] sm:$0xff] %vm647_vm5, %v733_v52 }
 0x266   : > { %782 = vst.msk [vmem:[%s1268_s28 + $0x110] sm:$0xff] %vm647_vm5, %v734_v53 }
 0x267   : > { %783 = vst.msk [vmem:[%s1268_s28 + $0x118] sm:$0xff] %vm647_vm5, %v735_v54 }
 0x268   : > { %784 = vst.msk [vmem:[%s1268_s28 + $0x120] sm:$0xff] %vm647_vm5, %v736_v55 }
 0x269   : > { %785 = vst.msk [vmem:[%s1268_s28 + $0x128] sm:$0xff] %vm647_vm5, %v737_v57 }
 0x26a   : > { %786 = vst.msk [vmem:[%s1268_s28 + $0x130] sm:$0xff] %vm647_vm5, %v738_v58 }
 0x26b   : > { %787 = vst.msk [vmem:[%s1268_s28 + $0x138] sm:$0xff] %vm647_vm5, %v739_v59 }
 0x26c   : > { %788 = vst.msk [vmem:[%s1268_s28 + $0x140] sm:$0xff] %vm647_vm5, %v740_v56 }
 0x26d   : > { %789 = vst.msk [vmem:[%s1268_s28 + $0x148] sm:$0xff] %vm647_vm5, %v741_v60 }
 0x26e   : > { %790 = vst.msk [vmem:[%s1268_s28 + $0x150] sm:$0xff] %vm647_vm5, %v742_v61 }
 0x26f   : > { %791 = vst.msk [vmem:[%s1268_s28 + $0x158] sm:$0xff] %vm647_vm5, %v743_v62 }
 0x270   : > { %792 = vst.msk [vmem:[%s1268_s28 + $0x160] sm:$0xff] %vm647_vm5, %v744_v1 }
 0x271   : > { %793 = vst.msk [vmem:[%s1268_s28 + $0x168] sm:$0xff] %vm647_vm5, %v745_v2 }
 0x272   : > { %794 = vst.msk [vmem:[%s1268_s28 + $0x170] sm:$0xff] %vm647_vm5, %v746_v3 }
 0x273   : > { %795 = vst.msk [vmem:[%s1268_s28 + $0x178] sm:$0xff] %vm647_vm5, %v747_v5 }
 0x274 PF: > { %s1746_s12 = sld [smem:[#allocation9_spill]]  ;;  %s1748_s9 = smov %s1102_s10 }
 0x275   : > { %s1747_s19 = sld [smem:[#allocation10_spill]]  ;;  %s1749_s10 = smov %s1106_s11 }
 0x276   : > { %s1750_s11 = smov %s1246_s1  ;;  %s1752_s13 = smov %s1122_s15 }
 0x277   : > { %s1754_s15 = smov %s1760_s30 }
 0x27a   : > { %s16_s16 = sadd.s32 1, %s1746_s12   ;;  %s1751_s12 = smov %s1118_s14 }
 0x27b   : > { %p13_p5 = scmp.ge.s32.totalorder %s16_s16, 6   ;;  %s1753_s14 = smov %s1747_s19 }
 0x27d   :  { %15 = sbr.rel (!%p13_p5) target bundleno = 8 (0x8), region = 80 }
 0x282   :  { %817 = vsyncpa [#allocation4], 1 }
 0x283   :  { %819 = vsyncpa [#allocation4 + $0x1], 1 }
 0x284   :  { %820 = vsyncpa [#allocation6], 1 }

</bundles_post_ra>
